<compile_context>
chip_gen: v7x
topology: tpu7x:2x2x1
jax: 0.10.0
libtpu: 0.0.40
codegen_flags: <defaults>
</compile_context>

<pallas_src>
import math

import jax
import jax.numpy as jnp
from jax.experimental import pallas as pl
from jax.experimental.pallas import tpu as pltpu


def _vmem_capacity_bytes():
    """Physical VMEM of the local TPU, with a conservative (v7x) fallback."""
    try:
        return int(pltpu.get_tpu_info().vmem_capacity_bytes)
    except Exception:
        return 64 * 1024 * 1024


def _linear_head_kernel(x_ref, w_ref, b_ref, o_ref):
    # x_ref: (tile_n, d_model) VMEM  (pipelined row tile; last block may be partial)
    # w_ref: (1, d_model)      VMEM  (resident; constant index_map)
    # b_ref: (1,)              SMEM  (scalar bias, f32)
    # o_ref: (1, tile_n)       VMEM  (lane-dense output block)
    w = w_ref[...].astype(x_ref.dtype)          # tiny cast; bf16 x -> bf16 MXU feed
    # 'od,nd->on': contract d_model on the MXU.  The result (1, tile_n) already
    # has the per-row sums in the lane dimension, so the store is a dense vst
    # and no (tile_n, 1) -> (1, tile_n) relayout is needed.
    acc = jax.lax.dot_general(
        w, x_ref[...],
        dimension_numbers=(((1,), (1,)), ((), ())),
        preferred_element_type=jnp.float32,
    )                                            # (1, tile_n) f32
    o_ref[...] = (acc + b_ref[0]).astype(o_ref.dtype)


def sentiment_regression_head(x, weight, bias, *, tile_n=None):
    """Pallas equivalent of nn.Linear(d_model, 1) applied along the last dim.

    x:      (..., d_model)
    weight: (1, d_model)   (PyTorch Linear layout)
    bias:   (1,)
    returns (..., 1) in x.dtype
    """
    d_model = x.shape[-1]
    lead_shape = x.shape[:-1]
    n_rows = 1
    for s in lead_shape:
        n_rows *= s
    if n_rows == 0:
        return jnp.zeros((*lead_shape, 1), x.dtype)

    x2d = x.reshape(n_rows, d_model)
    w2d = weight.reshape(1, d_model)
    b1d = bias.reshape(1).astype(jnp.float32)
    itemsize = jnp.dtype(x.dtype).itemsize

    # ---- Per-generation VMEM budget (v7x: 64 MiB -> limit 48 MiB, 12 MiB/buf;
    # v5e/v6e: 128 MiB -> limit 96 MiB, 24 MiB/buf). ----
    vmem_cap = _vmem_capacity_bytes()
    vmem_limit = int(min(96 * 2**20, (vmem_cap * 3) // 4))

    if tile_n is None:
        per_buf = min(24 * 2**20, max(2 * 2**20, vmem_limit // 4))
        tile_n = per_buf // max(1, d_model * itemsize)
        tile_n = min(tile_n, 8192)               # lifted from the old 1024 clamp

    x_in = x2d
    if n_rows >= 128:
        # Multiple of 128 rows: satisfies sublane packing for every dtype and
        # keeps the (1, tile_n) output block a whole number of lane groups.
        # tile_n <= n_rows, so only the *last* block is partial (no pad of x).
        tile_n = max(128, (min(tile_n, n_rows) // 128) * 128)
    else:
        # Tiny inputs: one block, rounded up to the dtype's sublane multiple.
        sub = max(8, 32 // itemsize)             # 8 f32 / 16 bf16 / 32 int8
        tile_n = ((n_rows + sub - 1) // sub) * sub
        if tile_n != n_rows:                     # < `sub` rows of a tiny array
            x_in = jnp.pad(x2d, ((0, tile_n - n_rows), (0, 0)))

    num_tiles = pl.cdiv(n_rows, tile_n)
    # Make sure the double-buffered x tile actually fits the requested limit.
    vmem_limit = int(max(vmem_limit, 2 * tile_n * d_model * itemsize + 4 * 2**20))

    cost = pl.CostEstimate(
        flops=2 * n_rows * d_model,
        transcendentals=0,
        bytes_accessed=(n_rows * d_model * itemsize                   # read x
                        + n_rows * itemsize                           # write y
                        + d_model * jnp.dtype(weight.dtype).itemsize  # read W
                        + jnp.dtype(bias.dtype).itemsize),            # read b
    )

    out = pl.pallas_call(
        _linear_head_kernel,
        out_shape=jax.ShapeDtypeStruct((1, num_tiles * tile_n), x.dtype),
        grid_spec=pltpu.PrefetchScalarGridSpec(
            num_scalar_prefetch=0,
            grid=(num_tiles,),
            in_specs=[
                pl.BlockSpec((tile_n, d_model), lambda i: (i, 0)),      # x rows (pipelined)
                pl.BlockSpec((1, d_model), lambda i: (0, 0)),           # weight (resident)
                pl.BlockSpec(memory_space=pltpu.MemorySpace.SMEM),      # bias scalar
            ],
            out_specs=pl.BlockSpec((1, tile_n), lambda i: (0, i)),      # lane-dense out
        ),
        compiler_params=pltpu.CompilerParams(
            dimension_semantics=("parallel",),   # megacore shards the row grid
            vmem_limit_bytes=vmem_limit,
        ),
        cost_estimate=cost,
    )(x_in, w2d, b1d)

    # Tail lanes (>= n_rows) hold garbage from the partial last block; drop them.
    return out[0, :n_rows].reshape(*lead_shape, 1)


def init_params(d_model, key):
    """Deterministic init matching nn.Linear(d_model, 1) default init."""
    kw, kb = jax.random.split(key)
    bound = 1.0 / math.sqrt(d_model)
    weight = jax.random.uniform(kw, (1, d_model), jnp.float32, -bound, bound)
    bias = jax.random.uniform(kb, (1,), jnp.float32, -bound, bound)
    return weight, bias


if __name__ == "__main__":
    key = jax.random.PRNGKey(0)
    k_x, k_p, k_x2, k_p2 = jax.random.split(key, 4)

    def _bf16_exact(a):
        # Round inputs to bf16-representable f32 values so the numeric check is
        # insensitive to MXU pass precision (bf16-exact inputs + f32 accumulation
        # give the same answer under every precision mode).
        return a.astype(jnp.bfloat16).astype(jnp.float32)

    # NOTE: the module's dropout ctor arg is unused in forward(), so there is
    # nothing to translate for it.

    # Case 1: tiny shapes (single-block small-row path).
    batch, seq, d_model = 2, 8, 128
    x = _bf16_exact(jax.random.normal(k_x, (batch, seq, d_model), jnp.float32))
    weight, bias = init_params(d_model, k_p)
    weight = _bf16_exact(weight)

    y = jax.block_until_ready(sentiment_regression_head(x, weight, bias))
    y_ref = x @ weight.T + bias
    assert y.shape == (batch, seq, 1), y.shape
    assert jnp.allclose(y, y_ref, atol=1e-4, rtol=1e-4), float(
        jnp.max(jnp.abs(y - y_ref))
    )

    # Case 2: ragged row count >= 128 (multi-tile grid, partial last block,
    # lane-dense output path) — still small.
    b2, s2, d2 = 3, 50, 384
    x2 = _bf16_exact(jax.random.normal(k_x2, (b2, s2, d2), jnp.float32))
    w2, bias2 = init_params(d2, k_p2)
    w2 = _bf16_exact(w2)

    y2 = jax.block_until_ready(sentiment_regression_head(x2, w2, bias2))
    y2_ref = x2 @ w2.T + bias2
    assert y2.shape == (b2, s2, 1), y2.shape
    assert jnp.allclose(y2, y2_ref, atol=1e-4, rtol=1e-4), float(
        jnp.max(jnp.abs(y2 - y2_ref))
    )

    print("KERNEL_OK")
</pallas_src>

<mosaic_0001>
module attributes {stable_mosaic.version = 11 : i64} {
  func.func @_linear_head_kernel(%arg0: i32, %arg1: memref<16x128xf32, #tpu.memory_space<vmem>>, %arg2: memref<1x128xf32, #tpu.memory_space<vmem>>, %arg3: memref<1xf32, #tpu.memory_space<smem>>, %arg4: memref<1x16xf32, #tpu.memory_space<vmem>>) attributes {dimension_semantics = [#tpu.dimension_semantics<parallel>], iteration_bounds = array<i64: 1>, scalar_prefetch = 0 : i64, scratch_operands = 0 : i64, tpu.core_type = #tpu.core_type<tc>, window_params = [{transform_indices = @transform_0, window_bounds = array<i64: 16, 128>}, {pipeline_mode = #tpu.pipeline_mode<synchronous>, transform_indices = @transform_1, window_bounds = array<i64: 1, 128>}, {transform_indices = @transform_2, window_bounds = array<i64: 1>}, {transform_indices = @transform_3, window_bounds = array<i64: 1, 16>}]} {
    %c0 = arith.constant 0 : index
    %c0_0 = arith.constant 0 : index
    %0 = vector.load %arg2[%c0, %c0_0] : memref<1x128xf32, #tpu.memory_space<vmem>>, vector<1x128xf32>
    %c0_1 = arith.constant 0 : index
    %c0_2 = arith.constant 0 : index
    %1 = vector.load %arg1[%c0_1, %c0_2] : memref<16x128xf32, #tpu.memory_space<vmem>>, vector<16x128xf32>
    %cst = arith.constant dense<0.000000e+00> : vector<1x16xf32>
    %2 = tpu.matmul %0, %1, %cst {dimension_numbers = #tpu.dot_dimension_numbers<[1], [1], [0], [0], [0, 0, 1, 0], [], []>} : vector<1x128xf32>, vector<16x128xf32>, vector<1x16xf32> -> vector<1x16xf32>
    %c0_3 = arith.constant 0 : index
    %3 = memref.load %arg3[%c0_3] : memref<1xf32, #tpu.memory_space<smem>>
    %4 = vector.broadcast %3 : f32 to vector<1x16xf32>
    %5 = arith.addf %2, %4 : vector<1x16xf32>
    %c0_4 = arith.constant 0 : index
    %c0_5 = arith.constant 0 : index
    %6 = vector.load %arg4[%c0_4, %c0_5] : memref<1x16xf32, #tpu.memory_space<vmem>>, vector<1x16xf32>
    tpu.vector_store %arg4[%c0_4, %c0_5], %5 {strides = array<i32>} : memref<1x16xf32, #tpu.memory_space<vmem>>, vector<1x16xf32>,
    return
  }
  func.func @transform_0(%arg0: i32) -> (i32, i32) {
    %c0_i32 = arith.constant 0 : i32
    %c0_i32_0 = arith.constant 0 : i32
    return %arg0, %c0_i32 : i32, i32
  }
  func.func @transform_1(%arg0: i32) -> (i32, i32) {
    %c0_i32 = arith.constant 0 : i32
    %c0_i32_0 = arith.constant 0 : i32
    %c0_i32_1 = arith.constant 0 : i32
    return %c0_i32, %c0_i32_0 : i32, i32
  }
  func.func @transform_2(%arg0: i32) -> i32 {
    %c0_i32 = arith.constant 0 : i32
    %c0_i32_0 = arith.constant 0 : i32
    return %c0_i32 : i32
  }
  func.func @transform_3(%arg0: i32) -> (i32, i32) {
    %c0_i32 = arith.constant 0 : i32
    %c0_i32_0 = arith.constant 0 : i32
    return %c0_i32, %arg0 : i32, i32
  }
}

</mosaic_0001>

<bundles_post_ra>
// kernel: tpu_custom_call.1
= control target key start
LH: loop header
LB: loop body
LE: loop exit
PB: predicated region body
PF: predicated region fallthrough
CT: control target
= control target key end

     0   :  { %9 = vsyncpa [#allocation4], 0  ;;  %s247_s0 = inlined_call_operand.hbm [shape: f32[16,128], index: 0, kind: input, shape index: {}]   ;;  %s248_s1 = inlined_call_operand.vmem [shape: f32[1,128], index: 1, kind: input, shape index: {}]   ;;  %s249_s2 = inlined_call_operand.<no memory space> [shape: f32[1], index: 2, kind: input, shape index: {}]   ;;  %s250_s3 = inlined_call_operand.hbm [shape: f32[1,16], index: 3, kind: output, shape index: {}]  }
   0x1   :  { %10 = vsyncpa [#allocation5], 0  ;;  %s190_s12 = smov [#allocation3]   ;;  %s142_s16 = scalar_lea.hbm %s247_s0, 256 }
   0x2   :  { %s16_s13 = sshll.u32 %s190_s12, 4  ;;  %p143_p0 = scmp.ne.s32.totalorder %s247_s0, %s142_s16  ;;  %s17_s13 = int_to_ptr.vmem [resolvable:$true] %s16_s13 }
   0x3   :  { %p146_p1 = scmp.lt.u32.totalorder %s142_s16, %s247_s0 }
   0x5   :  { %p148_p2 = pnand %p146_p1, %p143_p0 }
   0x7   :  { %151 = shalt.err (!%p148_p2)
}
   0x8   :  { %s152_s21 = scalar_lea.vmem %s17_s13, 256  ;;  %p157_p4 = scmp.lt.s32.totalorder %s17_s13, %s17_s13 }
   0x9   :  { %p153_p3 = scmp.ne.s32.totalorder %s17_s13, %s152_s21  ;;  %p158_p5 = scmp.lt.s32.totalorder %s152_s21, %s152_s21 }
   0xb   :  { %p159_p6 = por %p158_p5, %p157_p4 }
   0xd   :  { %p160_p7 = pnand %p159_p6, %p153_p3 }
   0xf   :  { %163 = shalt.err (!%p160_p7)
}
  0x10   :  { %s191_s22 = smov 128   ;;  %s192_s23 = smov 8  }
  0x11   :  { %22 = dma.hbm_to_vmem [thread:$0]  %s247_s0, 256, %s17_s13, [#allocation4], %s191_s22, %s191_s22, %s192_s23  }
  0x12   :  { %186 = dma.done.wait [#allocation4], 256  }
  0x13   :  { %187 = vsyncadd [#allocation4], 4294967040  ;;  %v193_v0 = vmov 0.0|0.0   ;;  %vm194_vm0 = vmmov 0   ;;  %v195_v1 = vmov 0.0   ;;  %v31_v2 = vld [vmem:[#allocation3] sm:$0xff]  ;;  %v34_v6 = vstv %s249_s2 }
  0x14   :  { %132 = vmatprep.subr.bf16.mxu0 %v193_v0  ;;  %129 = vmatprep.mubr.msk.f32.mxu0 %vm194_vm0, %v195_v1  ;;  %v32_v3 = vld [vmem:[#allocation3 + $0x8] sm:$0xff]  ;;  %v30_v5 = vld [vmem:[%s248_s1] sm:$0x1]  ;;  %s196_s0 = smov [#allocation6]   ;;  %vm105_vm1 = vcmask 122880  }
  0x15   :  { %v133_v4 = vpack.c.bf16 %v32_v3, %v31_v2  ;;  %s113_s30 = sshll.u32 %s196_s0, 4  ;;  %s114_s30 = int_to_ptr.vmem [resolvable:$true] %s113_s30 }
  0x16   :  { %s164_s4 = scalar_lea.vmem %s114_s30, 16  ;;  %s168_s5 = scalar_lea.vmem %s114_s30, 32 }
  0x17   :  { %134 = vmatpush3.bf16.xpose.msra.mxu0 %v133_v4  ;;  %p165_p8 = scmp.ne.s32.totalorder %s114_s30, %s164_s4  ;;  %p169_p9 = scmp.lt.s32.totalorder %s114_s30, %s114_s30 }
  0x18   :  { %p170_p10 = scmp.lt.s32.totalorder %s168_s5, %s164_s4 }
  0x1a   :  { %p171_p11 = por %p170_p10, %p169_p9 }
  0x1c   :  { %p172_p12 = pnand %p171_p11, %p165_p8 }
  0x1e   :  { %130 = vmatmul.mubr.f32.vlgmr.msra.gmra.mrb[0].mxu0 %v30_v5 }
  0xf1   :  { %v101_v7 = vpop.f32.mrb[0].mxu0 }
  0xf2   :  { %v102_v8 = vadd.f32 %v101_v7, %v34_v6  ;;  %v131_v9 = vpop.f32.mrb[1].mxu0 }
  0xf4   :  { %106 = vst.msk [vmem:[#allocation6] sm:$0x1] %vm105_vm1, %v102_v8 }
  0xf5   :  { %175 = shalt.err (!%p172_p12)
}
  0xf6   :  { %s176_s2 = scalar_lea.hbm %s250_s3, 16 }
  0xf7   :  { %p177_p13 = scmp.ne.s32.totalorder %s250_s3, %s176_s2  ;;  %p180_p0 = scmp.lt.u32.totalorder %s176_s2, %s250_s3 }
  0xf9   :  { %p182_p1 = pnand %p180_p0, %p177_p13 }
  0xfb   :  { %185 = shalt.err (!%p182_p1)
}
  0xfc   :  { %116 = dma.vmem_to_hbm [thread:$0]  %s114_s30, 16, %s250_s3, [#allocation5]  }
  0xfd   :  { %188 = dma.done.wait [#allocation5], 16  }
  0xfe   :  { %189 = vsyncadd [#allocation5], 4294967280 }
  0xff   :  { %120 = vsyncpa [#allocation4], 1 }
 0x100   :  { %121 = vsyncpa [#allocation5], 1 }

</bundles_post_ra>
